<compile_context>
chip_gen: v6e
topology: v6e:2x2x1
jax: 0.10.0
libtpu: 0.0.40
codegen_flags: <defaults>
</compile_context>

<pallas_src>
import jax
import jax.numpy as jnp
from jax.experimental import pallas as pl
from jax.experimental.pallas import tpu as pltpu

S_PAD = 8              # padded state feature dim (last dim == full array dim)
H_PAD = 128            # padded hidden dim (full 128-lane vreg / MXU width)
HEAD_PAD = 128         # lane-dense fused head output: lane 0 = mu, lane 1 = sigma
DEFAULT_TILE_B = 4096  # batch tile (amortizes per-grid-step overhead)
_VMEM_LIMIT_BYTES = 48 * 1024 * 1024


def _round_up(x, m):
    return ((x + m - 1) // m) * m


def _pad_to(x, shape):
    return jnp.pad(x, [(0, t - s) for s, t in zip(x.shape, shape)])


def actor_kernel(x_ref,
                 w1_ref, b1_ref, w2_ref, b2_ref, w3_ref, b3_ref, w4_ref, b4_ref,
                 whead_ref, bhead_ref,
                 out_ref):
    # Trunk: 4 x (Linear + ReLU). bf16 MXU inputs, f32 accumulation; the
    # activation is materialized exactly once (bf16) for the next matmul.
    def layer(h_bf16, w_ref, b_ref):
        acc = jnp.dot(h_bf16, w_ref[...],
                      preferred_element_type=jnp.float32) + b_ref[...]
        return jnp.maximum(acc, 0.0).astype(jnp.bfloat16)

    h = x_ref[...]                       # already bf16 (cast in the wrapper)
    h = layer(h, w1_ref, b1_ref)
    h = layer(h, w2_ref, b2_ref)
    h = layer(h, w3_ref, b3_ref)
    h = layer(h, w4_ref, b4_ref)

    # Fused heads: one (H_PAD, 128) matmul; lane 0 = mu, lane 1 = sigma,
    # lanes 2..127 are zero-weight padding (sliced off in the wrapper).
    pre = jnp.dot(h, whead_ref[...],
                  preferred_element_type=jnp.float32) + bhead_ref[...]

    mu = jnp.tanh(pre) * 2.0
    # numerically-stable softplus matching torch's threshold=20 behavior
    sp = jnp.where(pre > 20.0, pre, jnp.log1p(jnp.exp(jnp.minimum(pre, 20.0))))
    sigma = sp + 0.001

    lane = jax.lax.broadcasted_iota(jnp.int32, pre.shape, 1)
    out_ref[...] = jnp.where(lane == 0, mu, sigma)


def prepare_actor_params(params):
    """Pad / concat / bf16-cast the weights ONCE; reuse the result across calls.

    params: [(W, b)] for [l1, l2, l3, l4, mu, sigma]; W is (in, out), b is (out,).
    """
    (w1, b1), (w2, b2), (w3, b3), (w4, b4), (wmu, bmu), (wsig, bsig) = params
    w1p = _pad_to(w1, (S_PAD, H_PAD)).astype(jnp.bfloat16)
    w2p = _pad_to(w2, (H_PAD, H_PAD)).astype(jnp.bfloat16)
    w3p = _pad_to(w3, (H_PAD, H_PAD)).astype(jnp.bfloat16)
    w4p = _pad_to(w4, (H_PAD, H_PAD)).astype(jnp.bfloat16)
    b1p = _pad_to(b1.reshape(1, -1), (1, H_PAD)).astype(jnp.float32)
    b2p = _pad_to(b2.reshape(1, -1), (1, H_PAD)).astype(jnp.float32)
    b3p = _pad_to(b3.reshape(1, -1), (1, H_PAD)).astype(jnp.float32)
    b4p = _pad_to(b4.reshape(1, -1), (1, H_PAD)).astype(jnp.float32)
    # fused, lane-dense head: column 0 = mu, column 1 = sigma, rest zero
    whead = _pad_to(jnp.concatenate([wmu, wsig], axis=1),
                    (H_PAD, HEAD_PAD)).astype(jnp.bfloat16)
    bhead = _pad_to(jnp.concatenate([bmu.reshape(1, -1), bsig.reshape(1, -1)],
                                    axis=1), (1, HEAD_PAD)).astype(jnp.float32)
    return (w1p, b1p, w2p, b2p, w3p, b3p, w4p, b4p, whead, bhead)


def actor_forward(state, prepared_params, *, tile_b=DEFAULT_TILE_B):
    """state: (B, state_dim) f32.  prepared_params: output of prepare_actor_params."""
    B, S = state.shape
    assert S <= S_PAD

    # ---- batch tiling ----
    if B <= 256:
        tb = _round_up(B, 8)                      # tiny-B latency path: 1 grid step
    elif B <= 2 * tile_b:
        # force >= 2 tiles so ("parallel",) actually splits over v7x's 2 TCs
        tb = max(256, _round_up(pl.cdiv(B, 2), 8))
    else:
        tb = tile_b
    B_pad = _round_up(B, tb)
    grid = (B_pad // tb,)

    # pad batch, ship as bf16 (kernel consumes bf16 directly)
    x = _pad_to(state, (B_pad, S_PAD)).astype(jnp.bfloat16)
    weights = list(prepared_params)

    def const_spec(a):
        return pl.BlockSpec(a.shape, lambda i: (0, 0))   # VMEM-resident across grid

    in_specs = [pl.BlockSpec((tb, S_PAD), lambda i: (i, 0))] + \
               [const_spec(a) for a in weights]
    out_specs = pl.BlockSpec((tb, HEAD_PAD), lambda i: (i, 0))
    out_shape = jax.ShapeDtypeStruct((B_pad, HEAD_PAD), jnp.float32)

    flops = 2 * B_pad * (S_PAD * H_PAD + 3 * H_PAD * H_PAD + H_PAD * HEAD_PAD)
    transcendentals = 3 * B_pad * HEAD_PAD   # tanh + exp + log1p per head lane
    bytes_accessed = (x.size * x.dtype.itemsize + out_shape.size * 4
                      + sum(int(a.size) * a.dtype.itemsize for a in weights))

    out = pl.pallas_call(
        actor_kernel,
        out_shape=out_shape,
        grid=grid,
        in_specs=in_specs,
        out_specs=out_specs,
        compiler_params=pltpu.CompilerParams(
            dimension_semantics=("parallel",),        # shard batch grid over v7x TCs
            vmem_limit_bytes=_VMEM_LIMIT_BYTES),
        cost_estimate=pl.CostEstimate(flops=flops,
                                      transcendentals=transcendentals,
                                      bytes_accessed=bytes_accessed),
    )(x, *weights)

    mu = out[:B, 0:1]
    sigma = out[:B, 1:2]
    return mu, sigma


def init_linear(key, in_features, out_features):
    """Deterministic init mimicking torch.nn.Linear default (uniform +/- 1/sqrt(in))."""
    kw, kb = jax.random.split(key)
    bound = 1.0 / jnp.sqrt(jnp.float32(in_features))
    w = jax.random.uniform(kw, (in_features, out_features), jnp.float32, -bound, bound)
    b = jax.random.uniform(kb, (out_features,), jnp.float32, -bound, bound)
    return w, b


def make_actor_params(key, state_dim, hidden_dim):
    keys = jax.random.split(key, 6)
    return [
        init_linear(keys[0], state_dim, hidden_dim),
        init_linear(keys[1], hidden_dim, hidden_dim),
        init_linear(keys[2], hidden_dim, hidden_dim),
        init_linear(keys[3], hidden_dim, hidden_dim),
        init_linear(keys[4], hidden_dim, 1),   # mu head
        init_linear(keys[5], hidden_dim, 1),   # sigma head
    ]


def reference_forward(state, params):
    """Pure-JAX reference mirroring the kernel's math (bf16 matmul inputs, f32 accum)."""
    def bdot(a, w):
        return jnp.dot(a.astype(jnp.bfloat16), w.astype(jnp.bfloat16),
                       preferred_element_type=jnp.float32)
    h = state
    for w, b in params[:4]:
        h = jnp.maximum(bdot(h, w) + b, 0.0)
    (wmu, bmu), (wsig, bsig) = params[4], params[5]
    mu = jnp.tanh(bdot(h, wmu) + bmu) * 2.0
    sigma = jax.nn.softplus(bdot(h, wsig) + bsig) + 0.001
    return mu, sigma


if __name__ == "__main__":
    key = jax.random.PRNGKey(0)
    k_params, k_state, k_state2 = jax.random.split(key, 3)

    batch, state_dim, hidden_dim = 8, 4, 32
    params = make_actor_params(k_params, state_dim, hidden_dim)
    prepared = prepare_actor_params(params)   # pad/cast ONCE, reused below

    # small-shape check (single grid step, tiny-B path)
    state = jax.random.normal(k_state, (batch, state_dim), jnp.float32)
    mu, sigma = actor_forward(state, prepared)
    jax.block_until_ready((mu, sigma))
    mu_ref, sigma_ref = reference_forward(state, params)
    assert mu.shape == (batch, 1) and sigma.shape == (batch, 1)
    assert jnp.allclose(mu, mu_ref, atol=5e-3, rtol=5e-3)
    assert jnp.allclose(sigma, sigma_ref, atol=5e-3, rtol=5e-3)

    # exercise the >=2-tile batch-grid path (v7x 2-TC sharding) with ragged B
    big_b = 1040
    state2 = jax.random.normal(k_state2, (big_b, state_dim), jnp.float32)
    mu2, sigma2 = actor_forward(state2, prepared)
    jax.block_until_ready((mu2, sigma2))
    mu2_ref, sigma2_ref = reference_forward(state2, params)
    assert mu2.shape == (big_b, 1) and sigma2.shape == (big_b, 1)
    assert jnp.allclose(mu2, mu2_ref, atol=5e-3, rtol=5e-3)
    assert jnp.allclose(sigma2, sigma2_ref, atol=5e-3, rtol=5e-3)

    print("KERNEL_OK")
</pallas_src>

<mosaic_0001>
module attributes {stable_mosaic.version = 11 : i64} {
  func.func @actor_kernel(%arg0: i32, %arg1: memref<8x8xbf16, #tpu.memory_space<vmem>>, %arg2: memref<8x128xbf16, #tpu.memory_space<vmem>>, %arg3: memref<1x128xf32, #tpu.memory_space<vmem>>, %arg4: memref<128x128xbf16, #tpu.memory_space<vmem>>, %arg5: memref<1x128xf32, #tpu.memory_space<vmem>>, %arg6: memref<128x128xbf16, #tpu.memory_space<vmem>>, %arg7: memref<1x128xf32, #tpu.memory_space<vmem>>, %arg8: memref<128x128xbf16, #tpu.memory_space<vmem>>, %arg9: memref<1x128xf32, #tpu.memory_space<vmem>>, %arg10: memref<128x128xbf16, #tpu.memory_space<vmem>>, %arg11: memref<1x128xf32, #tpu.memory_space<vmem>>, %arg12: memref<8x128xf32, #tpu.memory_space<vmem>>) attributes {dimension_semantics = [#tpu.dimension_semantics<parallel>], iteration_bounds = array<i64: 1>, scalar_prefetch = 0 : i64, scratch_operands = 0 : i64, tpu.core_type = #tpu.core_type<tc>, window_params = [{transform_indices = @transform_0, window_bounds = array<i64: 8, 8>}, {pipeline_mode = #tpu.pipeline_mode<synchronous>, transform_indices = @transform_1, window_bounds = array<i64: 8, 128>}, {pipeline_mode = #tpu.pipeline_mode<synchronous>, transform_indices = @transform_2, window_bounds = array<i64: 1, 128>}, {pipeline_mode = #tpu.pipeline_mode<synchronous>, transform_indices = @transform_3, window_bounds = array<i64: 128, 128>}, {pipeline_mode = #tpu.pipeline_mode<synchronous>, transform_indices = @transform_4, window_bounds = array<i64: 1, 128>}, {pipeline_mode = #tpu.pipeline_mode<synchronous>, transform_indices = @transform_5, window_bounds = array<i64: 128, 128>}, {pipeline_mode = #tpu.pipeline_mode<synchronous>, transform_indices = @transform_6, window_bounds = array<i64: 1, 128>}, {pipeline_mode = #tpu.pipeline_mode<synchronous>, transform_indices = @transform_7, window_bounds = array<i64: 128, 128>}, {pipeline_mode = #tpu.pipeline_mode<synchronous>, transform_indices = @transform_8, window_bounds = array<i64: 1, 128>}, {pipeline_mode = #tpu.pipeline_mode<synchronous>, transform_indices = @transform_9, window_bounds = array<i64: 128, 128>}, {pipeline_mode = #tpu.pipeline_mode<synchronous>, transform_indices = @transform_10, window_bounds = array<i64: 1, 128>}, {transform_indices = @transform_11, window_bounds = array<i64: 8, 128>}]} {
    %c0 = arith.constant 0 : index
    %c0_0 = arith.constant 0 : index
    %0 = vector.load %arg1[%c0, %c0_0] : memref<8x8xbf16, #tpu.memory_space<vmem>>, vector<8x8xbf16>
    %c0_1 = arith.constant 0 : index
    %c0_2 = arith.constant 0 : index
    %1 = vector.load %arg2[%c0_1, %c0_2] : memref<8x128xbf16, #tpu.memory_space<vmem>>, vector<8x128xbf16>
    %cst = arith.constant dense<0.000000e+00> : vector<8x128xf32>
    %2 = tpu.matmul %0, %1, %cst {dimension_numbers = #tpu.dot_dimension_numbers<[1], [0], [0], [1], [0, 0, 1, 1], [], []>} : vector<8x8xbf16>, vector<8x128xbf16>, vector<8x128xf32> -> vector<8x128xf32>
    %c0_3 = arith.constant 0 : index
    %c0_4 = arith.constant 0 : index
    %3 = vector.load %arg3[%c0_3, %c0_4] : memref<1x128xf32, #tpu.memory_space<vmem>>, vector<1x128xf32>
    %4 = vector.broadcast %3 : vector<1x128xf32> to vector<8x128xf32>
    %5 = arith.addf %2, %4 : vector<8x128xf32>
    %cst_5 = arith.constant 0.000000e+00 : f32
    %6 = vector.broadcast %cst_5 : f32 to vector<8x128xf32>
    %7 = arith.maximumf %5, %6 : vector<8x128xf32>
    %8 = arith.truncf %7 : vector<8x128xf32> to vector<8x128xbf16>
    %c0_6 = arith.constant 0 : index
    %c0_7 = arith.constant 0 : index
    %9 = vector.load %arg4[%c0_6, %c0_7] : memref<128x128xbf16, #tpu.memory_space<vmem>>, vector<128x128xbf16>
    %cst_8 = arith.constant dense<0.000000e+00> : vector<8x128xf32>
    %10 = tpu.matmul %8, %9, %cst_8 {dimension_numbers = #tpu.dot_dimension_numbers<[1], [0], [0], [1], [0, 0, 1, 1], [], []>} : vector<8x128xbf16>, vector<128x128xbf16>, vector<8x128xf32> -> vector<8x128xf32>
    %c0_9 = arith.constant 0 : index
    %c0_10 = arith.constant 0 : index
    %11 = vector.load %arg5[%c0_9, %c0_10] : memref<1x128xf32, #tpu.memory_space<vmem>>, vector<1x128xf32>
    %12 = vector.broadcast %11 : vector<1x128xf32> to vector<8x128xf32>
    %13 = arith.addf %10, %12 : vector<8x128xf32>
    %cst_11 = arith.constant 0.000000e+00 : f32
    %14 = vector.broadcast %cst_11 : f32 to vector<8x128xf32>
    %15 = arith.maximumf %13, %14 : vector<8x128xf32>
    %16 = arith.truncf %15 : vector<8x128xf32> to vector<8x128xbf16>
    %c0_12 = arith.constant 0 : index
    %c0_13 = arith.constant 0 : index
    %17 = vector.load %arg6[%c0_12, %c0_13] : memref<128x128xbf16, #tpu.memory_space<vmem>>, vector<128x128xbf16>
    %cst_14 = arith.constant dense<0.000000e+00> : vector<8x128xf32>
    %18 = tpu.matmul %16, %17, %cst_14 {dimension_numbers = #tpu.dot_dimension_numbers<[1], [0], [0], [1], [0, 0, 1, 1], [], []>} : vector<8x128xbf16>, vector<128x128xbf16>, vector<8x128xf32> -> vector<8x128xf32>
    %c0_15 = arith.constant 0 : index
    %c0_16 = arith.constant 0 : index
    %19 = vector.load %arg7[%c0_15, %c0_16] : memref<1x128xf32, #tpu.memory_space<vmem>>, vector<1x128xf32>
    %20 = vector.broadcast %19 : vector<1x128xf32> to vector<8x128xf32>
    %21 = arith.addf %18, %20 : vector<8x128xf32>
    %cst_17 = arith.constant 0.000000e+00 : f32
    %22 = vector.broadcast %cst_17 : f32 to vector<8x128xf32>
    %23 = arith.maximumf %21, %22 : vector<8x128xf32>
    %24 = arith.truncf %23 : vector<8x128xf32> to vector<8x128xbf16>
    %c0_18 = arith.constant 0 : index
    %c0_19 = arith.constant 0 : index
    %25 = vector.load %arg8[%c0_18, %c0_19] : memref<128x128xbf16, #tpu.memory_space<vmem>>, vector<128x128xbf16>
    %cst_20 = arith.constant dense<0.000000e+00> : vector<8x128xf32>
    %26 = tpu.matmul %24, %25, %cst_20 {dimension_numbers = #tpu.dot_dimension_numbers<[1], [0], [0], [1], [0, 0, 1, 1], [], []>} : vector<8x128xbf16>, vector<128x128xbf16>, vector<8x128xf32> -> vector<8x128xf32>
    %c0_21 = arith.constant 0 : index
    %c0_22 = arith.constant 0 : index
    %27 = vector.load %arg9[%c0_21, %c0_22] : memref<1x128xf32, #tpu.memory_space<vmem>>, vector<1x128xf32>
    %28 = vector.broadcast %27 : vector<1x128xf32> to vector<8x128xf32>
    %29 = arith.addf %26, %28 : vector<8x128xf32>
    %cst_23 = arith.constant 0.000000e+00 : f32
    %30 = vector.broadcast %cst_23 : f32 to vector<8x128xf32>
    %31 = arith.maximumf %29, %30 : vector<8x128xf32>
    %32 = arith.truncf %31 : vector<8x128xf32> to vector<8x128xbf16>
    %c0_24 = arith.constant 0 : index
    %c0_25 = arith.constant 0 : index
    %33 = vector.load %arg10[%c0_24, %c0_25] : memref<128x128xbf16, #tpu.memory_space<vmem>>, vector<128x128xbf16>
    %cst_26 = arith.constant dense<0.000000e+00> : vector<8x128xf32>
    %34 = tpu.matmul %32, %33, %cst_26 {dimension_numbers = #tpu.dot_dimension_numbers<[1], [0], [0], [1], [0, 0, 1, 1], [], []>} : vector<8x128xbf16>, vector<128x128xbf16>, vector<8x128xf32> -> vector<8x128xf32>
    %c0_27 = arith.constant 0 : index
    %c0_28 = arith.constant 0 : index
    %35 = vector.load %arg11[%c0_27, %c0_28] : memref<1x128xf32, #tpu.memory_space<vmem>>, vector<1x128xf32>
    %36 = vector.broadcast %35 : vector<1x128xf32> to vector<8x128xf32>
    %37 = arith.addf %34, %36 : vector<8x128xf32>
    %38 = math.tanh %37 : vector<8x128xf32>
    %cst_29 = arith.constant 2.000000e+00 : f32
    %39 = vector.broadcast %cst_29 : f32 to vector<8x128xf32>
    %40 = arith.mulf %38, %39 : vector<8x128xf32>
    %cst_30 = arith.constant 2.000000e+01 : f32
    %41 = vector.broadcast %cst_30 : f32 to vector<8x128xf32>
    %42 = arith.cmpf ogt, %37, %41 : vector<8x128xf32>
    %cst_31 = arith.constant 2.000000e+01 : f32
    %43 = vector.broadcast %cst_31 : f32 to vector<8x128xf32>
    %44 = arith.minimumf %37, %43 : vector<8x128xf32>
    %45 = math.exp %44 : vector<8x128xf32>
    %46 = math.log1p %45 : vector<8x128xf32>
    %47 = arith.select %42, %37, %46 : vector<8x128xi1>, vector<8x128xf32>
    %cst_32 = arith.constant 1.000000e-03 : f32
    %48 = vector.broadcast %cst_32 : f32 to vector<8x128xf32>
    %49 = arith.addf %47, %48 : vector<8x128xf32>
    %50 = tpu.iota {dimensions = array<i32: 1>} : vector<8x128xi32>
    %c0_i32 = arith.constant 0 : i32
    %51 = vector.broadcast %c0_i32 : i32 to vector<8x128xi32>
    %52 = arith.cmpi eq, %50, %51 : vector<8x128xi32>
    %53 = arith.select %52, %40, %49 : vector<8x128xi1>, vector<8x128xf32>
    %c0_33 = arith.constant 0 : index
    %c0_34 = arith.constant 0 : index
    %54 = vector.load %arg12[%c0_33, %c0_34] : memref<8x128xf32, #tpu.memory_space<vmem>>, vector<8x128xf32>
    tpu.vector_store %arg12[%c0_33, %c0_34], %53 {strides = array<i32>} : memref<8x128xf32, #tpu.memory_space<vmem>>, vector<8x128xf32>,
    return
  }
  func.func @transform_0(%arg0: i32) -> (i32, i32) {
    %c0_i32 = arith.constant 0 : i32
    %c0_i32_0 = arith.constant 0 : i32
    return %arg0, %c0_i32 : i32, i32
  }
  func.func @transform_1(%arg0: i32) -> (i32, i32) {
    %c0_i32 = arith.constant 0 : i32
    %c0_i32_0 = arith.constant 0 : i32
    %c0_i32_1 = arith.constant 0 : i32
    return %c0_i32, %c0_i32_0 : i32, i32
  }
  func.func @transform_2(%arg0: i32) -> (i32, i32) {
    %c0_i32 = arith.constant 0 : i32
    %c0_i32_0 = arith.constant 0 : i32
    %c0_i32_1 = arith.constant 0 : i32
    return %c0_i32, %c0_i32_0 : i32, i32
  }
  func.func @transform_3(%arg0: i32) -> (i32, i32) {
    %c0_i32 = arith.constant 0 : i32
    %c0_i32_0 = arith.constant 0 : i32
    %c0_i32_1 = arith.constant 0 : i32
    return %c0_i32, %c0_i32_0 : i32, i32
  }
  func.func @transform_4(%arg0: i32) -> (i32, i32) {
    %c0_i32 = arith.constant 0 : i32
    %c0_i32_0 = arith.constant 0 : i32
    %c0_i32_1 = arith.constant 0 : i32
    return %c0_i32, %c0_i32_0 : i32, i32
  }
  func.func @transform_5(%arg0: i32) -> (i32, i32) {
    %c0_i32 = arith.constant 0 : i32
    %c0_i32_0 = arith.constant 0 : i32
    %c0_i32_1 = arith.constant 0 : i32
    return %c0_i32, %c0_i32_0 : i32, i32
  }
  func.func @transform_6(%arg0: i32) -> (i32, i32) {
    %c0_i32 = arith.constant 0 : i32
    %c0_i32_0 = arith.constant 0 : i32
    %c0_i32_1 = arith.constant 0 : i32
    return %c0_i32, %c0_i32_0 : i32, i32
  }
  func.func @transform_7(%arg0: i32) -> (i32, i32) {
    %c0_i32 = arith.constant 0 : i32
    %c0_i32_0 = arith.constant 0 : i32
    %c0_i32_1 = arith.constant 0 : i32
    return %c0_i32, %c0_i32_0 : i32, i32
  }
  func.func @transform_8(%arg0: i32) -> (i32, i32) {
    %c0_i32 = arith.constant 0 : i32
    %c0_i32_0 = arith.constant 0 : i32
    %c0_i32_1 = arith.constant 0 : i32
    return %c0_i32, %c0_i32_0 : i32, i32
  }
  func.func @transform_9(%arg0: i32) -> (i32, i32) {
    %c0_i32 = arith.constant 0 : i32
    %c0_i32_0 = arith.constant 0 : i32
    %c0_i32_1 = arith.constant 0 : i32
    return %c0_i32, %c0_i32_0 : i32, i32
  }
  func.func @transform_10(%arg0: i32) -> (i32, i32) {
    %c0_i32 = arith.constant 0 : i32
    %c0_i32_0 = arith.constant 0 : i32
    %c0_i32_1 = arith.constant 0 : i32
    return %c0_i32, %c0_i32_0 : i32, i32
  }
  func.func @transform_11(%arg0: i32) -> (i32, i32) {
    %c0_i32 = arith.constant 0 : i32
    %c0_i32_0 = arith.constant 0 : i32
    return %arg0, %c0_i32 : i32, i32
  }
}

</mosaic_0001>

<bundles_post_ra>
// kernel: tpu_custom_call.1
= control target key start
LH: loop header
LB: loop body
LE: loop exit
PB: predicated region body
PF: predicated region fallthrough
CT: control target
= control target key end

     0   :  { %16 = vsyncpa [#allocation3], 0  ;;  %s1190_s0 = inlined_call_operand.hbm [shape: bf16[8,8], index: 0, kind: input, shape index: {}]   ;;  %s1191_s1 = inlined_call_operand.hbm [shape: bf16[8,128], index: 1, kind: input, shape index: {}]   ;;  %s1192_s2 = inlined_call_operand.vmem [shape: f32[1,128], index: 2, kind: input, shape index: {}]   ;;  %s1193_s3 = inlined_call_operand.hbm [shape: bf16[128,128], index: 3, kind: input, shape index: {}]   ;;  %s1194_s4 = inlined_call_operand.vmem [shape: f32[1,128], index: 4, kind: input, shape index: {}]   ;;  %s1195_s5 = inlined_call_operand.hbm [shape: bf16[128,128], index: 5, kind: input, shape index: {}]   ;;  %s1196_s6 = inlined_call_operand.vmem [shape: f32[1,128], index: 6, kind: input, shape index: {}]   ;;  %s1197_s7 = inlined_call_operand.hbm [shape: bf16[128,128], index: 7, kind: input, shape index: {}]   ;;  %s1198_s8 = inlined_call_operand.vmem [shape: f32[1,128], index: 8, kind: input, shape index: {}]   ;;  %s1199_s9 = inlined_call_operand.hbm [shape: bf16[128,128], index: 9, kind: input, shape index: {}]   ;;  %s1200_s10 = inlined_call_operand.vmem [shape: f32[1,128], index: 10, kind: input, shape index: {}]   ;;  %s1201_s11 = inlined_call_operand.hbm [shape: f32[8,128], index: 11, kind: output, shape index: {}]  }
   0x1   :  { %17 = vsyncpa [#allocation6], 0 }
   0x2   :  { %18 = vsyncpa [#allocation9], 0 }
   0x3   :  { %19 = vsyncpa [#allocation12], 0 }
   0x4   :  { %20 = vsyncpa [#allocation4], 0  ;;  %s1028_s17 = smov [#allocation5]  }
   0x5   :  { %s37_s18 = sshll.u32 %s1028_s17, 4  ;;  %s38_s18 = int_to_ptr.vmem [resolvable:$true] %s37_s18 }
   0x6   :  { %s886_s19 = scalar_lea.vmem %s38_s18, 64  ;;  %p891_p1 = scmp.lt.s32.totalorder %s38_s18, %s38_s18 }
   0x7   :  { %p887_p0 = scmp.ne.s32.totalorder %s38_s18, %s886_s19  ;;  %p892_p2 = scmp.lt.s32.totalorder %s886_s19, %s886_s19 }
   0x9   :  { %p893_p3 = por %p892_p2, %p891_p1 }
   0xb   :  { %p894_p4 = pnand %p893_p3, %p887_p0 }
   0xd   :  { %897 = shalt.err (!%p894_p4)
}
   0xe   :  { %40 = dma.hbm_to_vmem [thread:$0]  %s1191_s1, 64, %s38_s18, [#allocation6]  }
   0xf   :  { %s1029_s22 = smov [#allocation8]   ;;  %s1030_s24 = smov [#allocation2]  }
  0x10   :  { %s62_s23 = sshll.u32 %s1029_s22, 4  ;;  %s27_s25 = sshll.u32 %s1030_s24, 4  ;;  %s63_s23 = int_to_ptr.vmem [resolvable:$true] %s62_s23  ;;  %s28_s25 = int_to_ptr.vmem [resolvable:$true] %s27_s25 }
  0x11   :  { %s906_s26 = scalar_lea.vmem %s63_s23, 1024  ;;  %p911_p6 = scmp.lt.s32.totalorder %s63_s23, %s63_s23 }
  0x12   :  { %p907_p5 = scmp.ne.s32.totalorder %s63_s23, %s906_s26  ;;  %p912_p7 = scmp.lt.s32.totalorder %s906_s26, %s906_s26 }
  0x14   :  { %p913_p8 = por %p912_p7, %p911_p6 }
  0x16   :  { %p914_p9 = pnand %p913_p8, %p907_p5 }
  0x18   :  { %917 = shalt.err (!%p914_p9)
}
  0x19   :  { %s1031_s27 = smov 64   ;;  %s1032_s28 = smov 4  }
  0x1a   :  { %68 = dma.hbm_to_vmem [thread:$0]  %s1195_s5, 1024, %s63_s23, [#allocation9], %s1031_s27, %s1031_s27, %s1032_s28  }
  0x1b   :  { %s926_s1 = scalar_lea.vmem %s28_s25, 64  ;;  %p931_p11 = scmp.lt.s32.totalorder %s28_s25, %s28_s25 }
  0x1c   :  { %p927_p10 = scmp.ne.s32.totalorder %s28_s25, %s926_s1  ;;  %p932_p12 = scmp.lt.s32.totalorder %s926_s1, %s926_s1 }
  0x1e   :  { %p933_p13 = por %p932_p12, %p931_p11 }
  0x20   :  { %p934_p0 = pnand %p933_p13, %p927_p10 }
  0x22   :  { %937 = shalt.err (!%p934_p0)
}
  0x23   :  { %30 = dma.hbm_to_vmem [thread:$0]  %s1190_s0, 64, %s28_s25, [#allocation3]  }
  0x24   :  { %s1033_s14 = smov [#allocation7]   ;;  %s1034_s16 = smov [#allocation10]  }
  0x25   :  { %s48_s15 = sshll.u32 %s1033_s14, 4  ;;  %s76_s17 = sshll.u32 %s1034_s16, 4  ;;  %s49_s15 = int_to_ptr.vmem [resolvable:$true] %s48_s15  ;;  %s77_s17 = int_to_ptr.vmem [resolvable:$true] %s76_s17 }
  0x26   :  { %s946_s18 = scalar_lea.vmem %s49_s15, 1024  ;;  %p951_p2 = scmp.lt.s32.totalorder %s49_s15, %s49_s15 }
  0x27   :  { %p947_p1 = scmp.ne.s32.totalorder %s49_s15, %s946_s18  ;;  %p952_p3 = scmp.lt.s32.totalorder %s946_s18, %s946_s18 }
  0x29   :  { %p953_p4 = por %p952_p3, %p951_p2 }
  0x2b   :  { %p954_p5 = pnand %p953_p4, %p947_p1 }
  0x2d   :  { %957 = shalt.err (!%p954_p5)
}
  0x2e   :  { %54 = dma.hbm_to_vmem [thread:$0]  %s1193_s3, 1024, %s49_s15, [#allocation6], %s1031_s27, %s1031_s27, %s1032_s28  }
  0x2f   :  { %s966_s0 = scalar_lea.vmem %s77_s17, 1024  ;;  %p971_p7 = scmp.lt.s32.totalorder %s77_s17, %s77_s17 }
  0x30   :  { %p967_p6 = scmp.ne.s32.totalorder %s77_s17, %s966_s0  ;;  %p972_p8 = scmp.lt.s32.totalorder %s966_s0, %s966_s0 }
  0x32   :  { %p973_p9 = por %p972_p8, %p971_p7 }
  0x34   :  { %p974_p10 = pnand %p973_p9, %p967_p6 }
  0x36   :  { %977 = shalt.err (!%p974_p10)
}
  0x37   :  { %82 = dma.hbm_to_vmem [thread:$0]  %s1197_s7, 1024, %s77_s17, [#allocation9], %s1031_s27, %s1031_s27, %s1032_s28  }
  0x38   :  { %s1035_s22 = smov [#allocation11]  }
  0x39   :  { %s90_s23 = sshll.u32 %s1035_s22, 4  ;;  %s91_s23 = int_to_ptr.vmem [resolvable:$true] %s90_s23 }
  0x3a   :  { %s986_s24 = scalar_lea.vmem %s91_s23, 1024  ;;  %p991_p12 = scmp.lt.s32.totalorder %s91_s23, %s91_s23 }
  0x3b   :  { %p987_p11 = scmp.ne.s32.totalorder %s91_s23, %s986_s24  ;;  %p992_p13 = scmp.lt.s32.totalorder %s986_s24, %s986_s24 }
  0x3d   :  { %p993_p0 = por %p992_p13, %p991_p12 }
  0x3f   :  { %p994_p1 = pnand %p993_p0, %p987_p11 }
  0x41   :  { %997 = shalt.err (!%p994_p1)
}
  0x42   :  { %96 = dma.hbm_to_vmem [thread:$0]  %s1199_s9, 1024, %s91_s23, [#allocation12], %s1031_s27, %s1031_s27, %s1032_s28  }
  0x43   :  { %1018 = dma.done.wait [#allocation3], 64  }
  0x44   :  { %1019 = vsyncadd [#allocation3], 4294967232 }
  0x45   :  { %1020 = dma.done.wait [#allocation6], 1088  }
  0x46   :  { %1021 = vsyncadd [#allocation6], 4294966208 }
  0x47   :  { %1022 = dma.done.wait [#allocation9], 2048  }
  0x48   :  { %1023 = vsyncadd [#allocation9], 4294965248 }
  0x49   :  { %1024 = dma.done.wait [#allocation12], 1024  }
  0x4a   :  { %1025 = vsyncadd [#allocation12], 4294966272  ;;  %v1036_v0 = vmov 0.0   ;;  %vm1037_vm0 = vmmov 0   ;;  %vm131_vm1 = vcmask 1043456   ;;  %vm127_vm2 = vcmask 64512  }
  0x4b   :  { %743 = vmatprep.subr.bf16.mxu0 %v1036_v0  ;;  %745 = vmatprep.mubr.msk.bf16.mxu0 %vm1037_vm0, %v1036_v0  ;;  %v119_v1 = vld [vmem:[#allocation5] sm:$0xf]  ;;  %v118_v4 = vld [vmem:[#allocation2] sm:$0xf]  ;;  %v841_v5 = vld [vmem:[#allocation7 + $0x30] sm:$0xff]  }
  0x4c   :  { %749 = vmatprep.subr.bf16.mxu1 %v1036_v0  ;;  %765 = vmatprep.mubr.msk.bf16.mxu1 %vm1037_vm0, %v1036_v0  ;;  %v133_v2 = vsel %vm131_vm1, %v119_v1, 0  ;;  %v840_v3 = vld [vmem:[#allocation7 + $0x38] sm:$0xff]   ;;  %v842_v6 = vld [vmem:[#allocation7 + $0x28] sm:$0xff]   ;;  %v843_v7 = vld [vmem:[#allocation7 + $0x20] sm:$0xff]  }
  0x4d   :  { %744 = vmatpush3.bf16.msra.mxu0 %v133_v2  ;;  %750 = vmatpush3.bf16.msra.mxu1 %v840_v3  ;;  %v844_v8 = vld [vmem:[#allocation7 + $0x18] sm:$0xff]   ;;  %v845_v9 = vld [vmem:[#allocation7 + $0x10] sm:$0xff]   ;;  %v846_v10 = vld [vmem:[#allocation7 + $0x8] sm:$0xff]  }
  0x4e   :  { %769 = vmatprep.subr.bf16.mxu0 %v1036_v0  ;;  %751 = vmatprep.subr.bf16.mxu1 %v1036_v0  ;;  %v847_v11 = vld [vmem:[#allocation7] sm:$0xff]   ;;  %v848_v12 = vld [vmem:[#allocation8 + $0x38] sm:$0xff]   ;;  %v849_v13 = vld [vmem:[#allocation8 + $0x30] sm:$0xff]  }
  0x4f   :  { %v850_v14 = vld [vmem:[#allocation8 + $0x28] sm:$0xff]   ;;  %v851_v15 = vld [vmem:[#allocation8 + $0x20] sm:$0xff]   ;;  %v852_v16 = vld [vmem:[#allocation8 + $0x18] sm:$0xff]  }
  0x50   :  { %746 = vmatmul.mubr.msk.bf16.vlgmr.msra.gmra.mxu0 %vm127_vm2, %v118_v4  ;;  %v853_v17 = vld [vmem:[#allocation8 + $0x10] sm:$0xff]   ;;  %v667_v18 = vld [vmem:[%s1192_s2] ss:$0 sm:$0xff]  ;;  %v854_v26 = vld [vmem:[#allocation8 + $0x8] sm:$0xff]  }
  0x51   :  { %785 = vmatprep.mubr.msk.bf16.mxu0 %vm1037_vm0, %v1036_v0  ;;  %752 = vmatpush3.bf16.msra.mxu1 %v841_v5  ;;  %v855_v27 = vld [vmem:[#allocation8] sm:$0xff]   ;;  %v856_v28 = vld [vmem:[#allocation10 + $0x38] sm:$0xff]   ;;  %v857_v29 = vld [vmem:[#allocation10 + $0x30] sm:$0xff]  }
  0x52   :  { %753 = vmatprep.subr.bf16.mxu1 %v1036_v0  ;;  %770 = vmatpush3.bf16.msra.mxu0 %v848_v12  ;;  %v858_v30 = vld [vmem:[#allocation10 + $0x28] sm:$0xff]   ;;  %v859_v31 = vld [vmem:[#allocation10 + $0x20] sm:$0xff]   ;;  %v860_v32 = vld [vmem:[#allocation10 + $0x18] sm:$0xff]  }
  0x53   :  { %771 = vmatprep.subr.bf16.mxu0 %v1036_v0  ;;  %v861_v33 = vld [vmem:[#allocation10 + $0x10] sm:$0xff]   ;;  %v669_v34 = vld [vmem:[%s1194_s4] ss:$0 sm:$0xff]  ;;  %v862_v42 = vld [vmem:[#allocation10 + $0x8] sm:$0xff]  }
  0x54   :  { %v863_v43 = vld [vmem:[#allocation10] sm:$0xff]   ;;  %v864_v44 = vld [vmem:[#allocation11 + $0x38] sm:$0xff]   ;;  %v865_v45 = vld [vmem:[#allocation11 + $0x30] sm:$0xff]  }
  0x55   :  { %754 = vmatpush3.bf16.msra.mxu1 %v842_v6  ;;  %v866_v46 = vld [vmem:[#allocation11 + $0x28] sm:$0xff]   ;;  %v867_v47 = vld [vmem:[#allocation11 + $0x20] sm:$0xff]   ;;  %v868_v48 = vld [vmem:[#allocation11 + $0x18] sm:$0xff]  }
  0x56   :  { %755 = vmatprep.subr.bf16.mxu1 %v1036_v0  ;;  %772 = vmatpush3.bf16.msra.mxu0 %v849_v13  ;;  %v869_v49 = vld [vmem:[#allocation11 + $0x10] sm:$0xff]   ;;  %v678_v50 = vld [vmem:[%s1196_s6] ss:$0 sm:$0xff]  ;;  %v870_v58 = vld [vmem:[#allocation11 + $0x8] sm:$0xff]  }
  0x57   :  { %773 = vmatprep.subr.bf16.mxu0 %v1036_v0  ;;  %v871_v59 = vld [vmem:[#allocation11] sm:$0xff]   ;;  %v687_v60 = vld [vmem:[%s1198_s8] ss:$0 sm:$0xff]  ;;  %s1038_s8 = smov [#allocation13]  }
  0x58   :  { %v696_v5 = vld [vmem:[%s1200_s10] ss:$0 sm:$0xff]  ;;  %s655_s10 = sshll.u32 %s1038_s8, 4  ;;  %s656_s10 = int_to_ptr.vmem [resolvable:$true] %s655_s10 }
  0x59   :  { %756 = vmatpush3.bf16.msra.mxu1 %v843_v7  ;;  %s998_s1 = scalar_lea.vmem %s656_s10, 128  ;;  %p1003_p3 = scmp.lt.s32.totalorder %s656_s10, %s656_s10 }
  0x5a   :  { %757 = vmatprep.subr.bf16.mxu1 %v1036_v0  ;;  %774 = vmatpush3.bf16.msra.mxu0 %v850_v14  ;;  %p999_p2 = scmp.ne.s32.totalorder %s656_s10, %s998_s1  ;;  %p1004_p4 = scmp.lt.s32.totalorder %s998_s1, %s998_s1 }
  0x5b   :  { %775 = vmatprep.subr.bf16.mxu0 %v1036_v0 }
  0x5c   :  { %p1005_p5 = por %p1004_p4, %p1003_p3 }
  0x5d   :  { %758 = vmatpush3.bf16.msra.mxu1 %v844_v8 }
  0x5e   :  { %759 = vmatprep.subr.bf16.mxu1 %v1036_v0  ;;  %776 = vmatpush3.bf16.msra.mxu0 %v851_v15  ;;  %v644_v15 = vlaneseq  ;;  %p1006_p6 = pnand %p1005_p5, %p999_p2 }
  0x5f   :  { %777 = vmatprep.subr.bf16.mxu0 %v1036_v0 }
  0x61   :  { %760 = vmatpush3.bf16.msra.mxu1 %v845_v9 }
  0x62   :  { %761 = vmatprep.subr.bf16.mxu1 %v1036_v0  ;;  %778 = vmatpush3.bf16.msra.mxu0 %v852_v16 }
  0x63   :  { %779 = vmatprep.subr.bf16.mxu0 %v1036_v0 }
  0x65   :  { %762 = vmatpush3.bf16.msra.mxu1 %v846_v10 }
  0x66   :  { %763 = vmatprep.subr.bf16.mxu1 %v1036_v0  ;;  %780 = vmatpush3.bf16.msra.mxu0 %v853_v17 }
  0x67   :  { %781 = vmatprep.subr.bf16.mxu0 %v1036_v0 }
  0x69   :  { %764 = vmatpush3.bf16.msra.mxu1 %v847_v11 }
  0x6a   :  { %789 = vmatprep.subr.bf16.mxu1 %v1036_v0  ;;  %782 = vmatpush3.bf16.msra.mxu0 %v854_v26 }
  0x6b   :  { %783 = vmatprep.subr.bf16.mxu0 %v1036_v0 }
  0x6e   :  { %784 = vmatpush3.bf16.msra.mxu0 %v855_v27 }
  0x6f   :  { %809 = vmatprep.subr.bf16.mxu0 %v1036_v0 }
 0x110   :  { %v169_v19 = vpop.f32.mrf.mxu0 }
 0x111   :  { %v170_v20 = vadd.f32 %v667_v18, %v169_v19  ;;  %v645_v19 = vand.u32 127, %v644_v15 }
 0x112   :  { %v747_v21 = vpop.f32.mrf.mxu0 }
 0x113   :  { %v175_v22 = vmax.f32 %v170_v20, 0.0  ;;  %vm646_vm5 = vcmp.eq.s32.totalorder %v645_v19, 0 }
 0x114   :  { %v172_v23 = vpop.f32.mrf.mxu0 }
 0x115   :  { %v176_v24 = vpack.c.bf16 %v175_v22, %v175_v22 }
 0x116   :  { %v748_v25 = vpop.f32.mrf.mxu0 }
 0x117   :  { %766 = vmatmul.mubr.bf16.vlgmr.msra.gmra.mxu1 %v176_v24 }
 0x118   :  { %805 = vmatprep.mubr.msk.bf16.mxu1 %vm1037_vm0, %v1036_v0  ;;  %790 = vmatpush3.bf16.msra.mxu1 %v856_v28 }
 0x119   :  { %791 = vmatprep.subr.bf16.mxu1 %v1036_v0 }
 0x11c   :  { %792 = vmatpush3.bf16.msra.mxu1 %v857_v29 }
 0x11d   :  { %793 = vmatprep.subr.bf16.mxu1 %v1036_v0 }
 0x120   :  { %794 = vmatpush3.bf16.msra.mxu1 %v858_v30 }
 0x121   :  { %795 = vmatprep.subr.bf16.mxu1 %v1036_v0 }
 0x124   :  { %796 = vmatpush3.bf16.msra.mxu1 %v859_v31 }
 0x125   :  { %797 = vmatprep.subr.bf16.mxu1 %v1036_v0 }
 0x128   :  { %798 = vmatpush3.bf16.msra.mxu1 %v860_v32 }
 0x129   :  { %799 = vmatprep.subr.bf16.mxu1 %v1036_v0 }
 0x12c   :  { %800 = vmatpush3.bf16.msra.mxu1 %v861_v33 }
 0x12d   :  { %801 = vmatprep.subr.bf16.mxu1 %v1036_v0 }
 0x130   :  { %802 = vmatpush3.bf16.msra.mxu1 %v862_v42 }
 0x131   :  { %803 = vmatprep.subr.bf16.mxu1 %v1036_v0 }
 0x134   :  { %804 = vmatpush3.bf16.msra.mxu1 %v863_v43 }
 0x1d7   :  { %v282_v35 = vpop.f32.mrf.mxu1 }
 0x1d8   :  { %v283_v36 = vadd.f32 %v669_v34, %v282_v35 }
 0x1d9   :  { %v767_v37 = vpop.f32.mrf.mxu1 }
 0x1da   :  { %v288_v38 = vmax.f32 %v283_v36, 0.0 }
 0x1db   :  { %v285_v39 = vpop.f32.mrf.mxu1 }
 0x1dc   :  { %v289_v40 = vpack.c.bf16 %v288_v38, %v288_v38 }
 0x1dd   :  { %v768_v41 = vpop.f32.mrf.mxu1 }
 0x1de   :  { %786 = vmatmul.mubr.bf16.vlgmr.msra.gmra.mxu0 %v289_v40 }
 0x1df   :  { %825 = vmatprep.mubr.msk.bf16.mxu0 %vm1037_vm0, %v1036_v0  ;;  %810 = vmatpush3.bf16.msra.mxu0 %v864_v44 }
 0x1e0   :  { %811 = vmatprep.subr.bf16.mxu0 %v1036_v0 }
 0x1e3   :  { %812 = vmatpush3.bf16.msra.mxu0 %v865_v45 }
 0x1e4   :  { %813 = vmatprep.subr.bf16.mxu0 %v1036_v0 }
 0x1e7   :  { %814 = vmatpush3.bf16.msra.mxu0 %v866_v46 }
 0x1e8   :  { %815 = vmatprep.subr.bf16.mxu0 %v1036_v0 }
 0x1eb   :  { %816 = vmatpush3.bf16.msra.mxu0 %v867_v47 }
 0x1ec   :  { %817 = vmatprep.subr.bf16.mxu0 %v1036_v0 }
 0x1ef   :  { %818 = vmatpush3.bf16.msra.mxu0 %v868_v48 }
 0x1f0   :  { %819 = vmatprep.subr.bf16.mxu0 %v1036_v0 }
 0x1f3   :  { %820 = vmatpush3.bf16.msra.mxu0 %v869_v49 }
 0x1f4   :  { %821 = vmatprep.subr.bf16.mxu0 %v1036_v0 }
 0x1f7   :  { %822 = vmatpush3.bf16.msra.mxu0 %v870_v58 }
 0x1f8   :  { %823 = vmatprep.subr.bf16.mxu0 %v1036_v0 }
 0x1fb   :  { %824 = vmatpush3.bf16.msra.mxu0 %v871_v59 }
 0x29e   :  { %v395_v51 = vpop.f32.mrf.mxu0 }
 0x29f   :  { %v396_v52 = vadd.f32 %v678_v50, %v395_v51 }
 0x2a0   :  { %v787_v53 = vpop.f32.mrf.mxu0 }
 0x2a1   :  { %v401_v54 = vmax.f32 %v396_v52, 0.0 }
 0x2a2   :  { %v398_v55 = vpop.f32.mrf.mxu0 }
 0x2a3   :  { %v402_v56 = vpack.c.bf16 %v401_v54, %v401_v54 }
 0x2a4   :  { %v788_v57 = vpop.f32.mrf.mxu0 }
 0x2a5   :  { %806 = vmatmul.mubr.bf16.vlgmr.msra.gmra.mxu1 %v402_v56 }
 0x365   :  { %v508_v61 = vpop.f32.mrf.mxu1 }
 0x366   :  { %v509_v62 = vadd.f32 %v687_v60, %v508_v61 }
 0x367   :  { %v807_v63 = vpop.f32.mrf.mxu1 }
 0x368   :  { %v514_v1 = vmax.f32 %v509_v62, 0.0 }
 0x369   :  { %v511_v2 = vpop.f32.mrf.mxu1 }
 0x36a   :  { %v515_v3 = vpack.c.bf16 %v514_v1, %v514_v1 }
 0x36b   :  { %v808_v4 = vpop.f32.mrf.mxu1 }
 0x36c   :  { %826 = vmatmul.mubr.bf16.vlgmr.msra.gmra.mxu0 %v515_v3 }
 0x42c   :  { %v621_v6 = vpop.f32.mrf.mxu0 }
 0x42d   :  { %v622_v0 = vadd.f32 %v696_v5, %v621_v6 }
 0x42e   :  { %v827_v7 = vpop.f32.mrf.mxu0 }
 0x42f   :  { %v630_v8 = vmin.f32 %v622_v0, 20.0  ;;  %vm629_vm4 = vcmp.gt.f32.partialorder %v622_v0, 20.0 }
 0x430   :  { %v624_v9 = vpop.f32.mrf.mxu0 }
 0x431   :  { %v631_v10 = vmul.f32 1.442695, %v630_v8 }
 0x432   :  { %v828_v11 = vpop.f32.mrf.mxu0 }
 0x433   :  { %872 = vpow2.f32 %v631_v10 }
 0x440   :  { %v873_v12 = vpop.eup %872 }
 0x441   :  { %v633_v13 = vadd.f32 1.0, %v873_v12  ;;  %v636_v14 = vmul.f32 -0.5, %v873_v12  ;;  %v639_v17 = vand.u32 2147483647, %v873_v12 }
 0x443   :  { %874 = vlog2.f32 %v633_v13  ;;  %v637_v16 = vadd.f32 1.0, %v636_v14  ;;  %vm640_vm3 = vcmp.lt.f32.partialorder %v639_v17, 0.0004427343 }
 0x444   :  { %876 = vtanh.f32 %v622_v0 }
 0x445   :  { %v638_v21 = vmul.f32 %v873_v12, %v637_v16 }
 0x450   :  { %v875_v18 = vpop.eup %874 }
 0x451   :  { %v635_v20 = vmul.f32 0.6931472, %v875_v18  ;;  %v877_v22 = vpop.eup %876 }
 0x452   :  { %v628_v25 = vmul.f32 2.0, %v877_v22 }
 0x453   :  { %v641_v23 = vsel %vm640_vm3, %v638_v21, %v635_v20 }
 0x454   :  { %v642_v24 = vsel %vm629_vm4, %v622_v0, %v641_v23 }
 0x455   :  { %v643_v26 = vadd.f32 0.001, %v642_v24 }
 0x457   :  { %v647_v27 = vsel %vm646_vm5, %v628_v25, %v643_v26 }
 0x458   :  { %648 = vst [vmem:[#allocation13] sm:$0xff] %v647_v27 }
 0x459   :  { %1009 = shalt.err (!%p1006_p6)
}
 0x45a   :  { %658 = dma.vmem_to_hbm [thread:$0]  %s656_s10, 128, %s1201_s11, [#allocation4]  }
 0x45b   :  { %1026 = dma.done.wait [#allocation4], 128  }
 0x45c   :  { %1027 = vsyncadd [#allocation4], 4294967168 }
 0x45d   :  { %662 = vsyncpa [#allocation3], 1 }
 0x45e   :  { %663 = vsyncpa [#allocation6], 1 }
 0x45f   :  { %664 = vsyncpa [#allocation9], 1 }
 0x460   :  { %665 = vsyncpa [#allocation12], 1 }
 0x461   :  { %666 = vsyncpa [#allocation4], 1 }

</bundles_post_ra>
